<compile_context>
chip_gen: v7x
topology: tpu7x:2x2x1
jax: 0.10.0
libtpu: 0.0.40
codegen_flags: <defaults>
</compile_context>

<pallas_src>
import functools

import jax
import jax.numpy as jnp
from jax import lax
from jax.experimental import pallas as pl
from jax.experimental.pallas import tpu as pltpu

_EPS = 1e-5                      # nn.LayerNorm default
_INV_SQRT2 = 0.7071067811865476


def _round_up(n, m):
    return (n + m - 1) // m * m


def _gelu(h, approximate):
    if approximate:
        return jax.nn.gelu(h, approximate=True)
    # nn.GELU() default: exact erf-based GELU.
    return 0.5 * h * (1.0 + lax.erf(h * _INV_SQRT2))


def _pick_tk(fp_in, tk_max):
    """Largest multiple-of-128 divisor of fp_in that is <= tk_max."""
    best, d = 128, 128
    while d <= fp_in:
        if fp_in % d == 0 and d <= tk_max:
            best = d
        d += 128
    return best


def _residual_block_kernel(*refs, f_out, fp_out, has_project, has_xfull,
                           compute_dtype, approx_gelu):
    if has_xfull:
        x_ref, xfull_ref, w1p_ref, w2_ref, prow_ref, o_ref, acc_ref = refs
    else:
        x_ref, w1p_ref, w2_ref, prow_ref, o_ref, acc_ref = refs
        xfull_ref = None

    k = pl.program_id(1)
    nk = pl.num_programs(1)

    @pl.when(k == 0)
    def _():
        acc_ref[...] = jnp.zeros_like(acc_ref)

    # K-tiled first matmul: x_tile @ [w1 | wp]  (f32 accumulation).
    acc_ref[...] += jnp.dot(x_ref[...].astype(compute_dtype), w1p_ref[...],
                            preferred_element_type=jnp.float32)

    @pl.when(k == nk - 1)
    def _():
        # Packed (8, Fp_out) param rows: b1, bp, b2, g1, be1, g2, be2, 0.
        b1 = prow_ref[0:1, :]
        bp = prow_ref[1:2, :]
        b2 = prow_ref[2:3, :]
        g1 = prow_ref[3:4, :]
        be1 = prow_ref[4:5, :]
        g2 = prow_ref[5:6, :]
        be2 = prow_ref[6:7, :]

        acc = acc_ref[...]
        if has_project:
            h = acc[:, :fp_out] + b1
            identity = acc[:, fp_out:] + bp
        else:
            # project is None -> identity is the exact (f32) input.
            src = xfull_ref if has_xfull else x_ref
            h = acc + b1
            identity = src[...].astype(jnp.float32)

        inv_n = jnp.float32(1.0 / f_out)

        def layernorm(v, gamma, beta):
            # Padded feature columns of v are exactly zero (zero-padded
            # weights / biases), so plain sums over the padded width divided
            # by the true F_out give valid statistics -> no masking needed.
            mu = jnp.sum(v, axis=-1, keepdims=True) * inv_n
            var = jnp.sum(v * v, axis=-1, keepdims=True) * inv_n - mu * mu
            return (v - mu) * lax.rsqrt(var + _EPS) * gamma + beta

        # linear1 -> norm1 -> GELU -> dropout (eval mode: identity)
        h = _gelu(layernorm(h, g1, be1), approx_gelu)
        # TODO(synk): training-mode Dropout(0.1) via pltpu.prng_* not wired.

        # linear2 -> norm2
        h = jnp.dot(h.astype(compute_dtype), w2_ref[...],
                    preferred_element_type=jnp.float32) + b2
        h = layernorm(h, g2, be2)

        # residual add + GELU
        o_ref[...] = _gelu(h + identity, approx_gelu).astype(o_ref.dtype)


def _const_block_spec(shape):
    """Grid-invariant block: single-buffer it when the API allows."""
    idx = lambda i, k: (0, 0)
    if hasattr(pl, "Buffered"):
        try:
            return pl.BlockSpec(shape, idx, pipeline_mode=pl.Buffered(1))
        except Exception:  # pragma: no cover - older pipeline_mode API
            pass
    return pl.BlockSpec(shape, idx)


def prepare_params(params, *, use_bf16=True, feature_align=128):
    """Pad / fuse / cast weights ONCE (hoisted out of the per-call hot path).

    feature_align: 128 (v5e) is always safe; 256 better fills the v6e/v7x MXU.
    """
    f_in, f_out = params["w1"].shape
    fp_in = _round_up(f_in, feature_align)
    fp_out = _round_up(f_out, feature_align)
    wdt = jnp.bfloat16 if use_bf16 else jnp.float32
    has_project = "wp" in params

    def pad2d(a, r, c):
        return jnp.pad(a, ((0, r - a.shape[0]), (0, c - a.shape[1])))

    w1 = pad2d(params["w1"], fp_in, fp_out)
    if has_project:
        # Fuse the real projection into one MXU pass: x @ [w1 | wp].
        w1p = jnp.concatenate([w1, pad2d(params["wp"], fp_in, fp_out)], axis=1)
    else:
        w1p = w1
    w2p = pad2d(params["w2"], fp_out, fp_out)

    zeros = jnp.zeros((1, fp_out), jnp.float32)
    prow = jnp.concatenate(
        [pad2d(params["b1"], 1, fp_out),
         pad2d(params["bp"], 1, fp_out) if has_project else zeros,
         pad2d(params["b2"], 1, fp_out),
         pad2d(params["g1"], 1, fp_out),
         pad2d(params["be1"], 1, fp_out),
         pad2d(params["g2"], 1, fp_out),
         pad2d(params["be2"], 1, fp_out),
         zeros], axis=0).astype(jnp.float32)

    return {"w1p": w1p.astype(wdt), "w2p": w2p.astype(wdt), "prow": prow,
            "f_in": f_in, "f_out": f_out}


@functools.partial(
    jax.jit,
    static_argnames=("f_out", "block_b", "use_bf16", "approx_gelu",
                     "vmem_budget_bytes"))
def residual_block_prepared(x, w1p, w2p, prow, *, f_out, block_b=256,
                            use_bf16=True, approx_gelu=False,
                            vmem_budget_bytes=None):
    B, F_in = x.shape
    Fp_in, N1 = w1p.shape
    Fp_out = w2p.shape[0]
    has_project = (N1 == 2 * Fp_out)

    # ---- Batch tiling.  Guarantee >= 2 grid steps when the batch allows so
    # the "parallel" axis can shard across v7x's two TensorCores.
    # (On v5e, block_b=128 halves f32 temporaries with no MXU loss.)
    Bp8 = _round_up(B, 8)
    bb = max(8, min(_round_up(block_b, 8), Bp8))
    if Bp8 > 8 and _round_up(B, bb) // bb < 2:
        bb = _round_up((Bp8 + 1) // 2, 8)
    Bp = _round_up(B, bb)
    grid_b = Bp // bb

    # ---- Dtypes.  When project is None the residual is x itself; keep the
    # x stream f32 so the identity path matches the module exactly.
    compute_dtype = jnp.bfloat16 if use_bf16 else jnp.float32
    x_stream_dtype = compute_dtype if (use_bf16 and has_project) else x.dtype
    out_dtype = x.dtype
    x_p = jnp.pad(x, ((0, Bp - B), (0, Fp_in - F_in))).astype(x_stream_dtype)

    wbytes = jnp.dtype(w1p.dtype).itemsize
    xbytes = jnp.dtype(x_stream_dtype).itemsize
    obytes = jnp.dtype(out_dtype).itemsize

    # ---- Device-aware VMEM budget -> decide whether w1(|wp) stays resident
    # or is streamed over a K (F_in) grid axis.
    try:
        vmem_cap = int(pltpu.get_tpu_info().vmem_capacity_bytes)
    except Exception:
        vmem_cap = 64 * 2**20          # conservative fallback (v7x per-TC)
    plan_budget = (int(vmem_budget_bytes) if vmem_budget_bytes is not None
                   else int(0.80 * vmem_cap))

    fixed = (Fp_out * Fp_out * wbytes                     # w2 (single-buffered)
             + 2 * 8 * Fp_out * 4                         # packed param rows
             + bb * N1 * 4                                # f32 accumulator
             + (0 if has_project else 2 * bb * Fp_out * 4)  # full-row x (identity)
             + 2 * bb * Fp_out * obytes                   # output (double-buffered)
             + 6 * bb * Fp_out * 4)                       # f32 temporaries headroom

    resident_w1 = Fp_in * N1 * wbytes + 2 * bb * Fp_in * xbytes
    if fixed + resident_w1 <= plan_budget:
        tk = Fp_in                                        # weights fully resident
    else:
        denom = 2 * (N1 * wbytes + bb * xbytes)
        tk_max = max(128, ((plan_budget - fixed) // max(denom, 1)) // 128 * 128)
        tk = _pick_tk(Fp_in, tk_max)
    nk = Fp_in // tk
    has_xfull = (not has_project) and (nk > 1)

    need = fixed + (resident_w1 if nk == 1
                    else 2 * tk * N1 * wbytes + 2 * bb * tk * xbytes)
    vmem_limit = int(min(max(int(0.85 * vmem_cap), 32 * 2**20),
                         max(need + (8 << 20), 32 * 2**20)))

    # ---- BlockSpecs.
    in_specs = [pl.BlockSpec((bb, tk), lambda i, k: (i, k))]     # x tile
    inputs = [x_p]
    if has_xfull:
        # Full-row x, fetched once per batch tile, used only for the residual.
        in_specs.append(pl.BlockSpec((bb, Fp_in), lambda i, k: (i, 0)))
        inputs.append(x_p)
    if nk == 1:
        in_specs.append(_const_block_spec((tk, N1)))             # resident w1(|wp)
    else:
        in_specs.append(pl.BlockSpec((tk, N1), lambda i, k: (k, 0)))  # streamed
    in_specs.append(_const_block_spec((Fp_out, Fp_out)))         # w2
    in_specs.append(_const_block_spec((8, Fp_out)))              # packed params
    inputs += [w1p, w2p, prow]

    cost = pl.CostEstimate(
        flops=2 * Bp * (Fp_in * N1 + Fp_out * Fp_out),
        transcendentals=2 * Bp * Fp_out,
        bytes_accessed=(Bp * Fp_in * xbytes
                        + (grid_b if nk > 1 else 1) * Fp_in * N1 * wbytes
                        + Fp_out * Fp_out * wbytes
                        + Bp * Fp_out * obytes))

    kernel = functools.partial(
        _residual_block_kernel,
        f_out=f_out, fp_out=Fp_out, has_project=has_project,
        has_xfull=has_xfull, compute_dtype=compute_dtype,
        approx_gelu=approx_gelu)

    out_p = pl.pallas_call(
        kernel,
        out_shape=jax.ShapeDtypeStruct((Bp, Fp_out), out_dtype),
        grid_spec=pltpu.PrefetchScalarGridSpec(
            num_scalar_prefetch=0,
            grid=(grid_b, nk),
            in_specs=in_specs,
            out_specs=pl.BlockSpec((bb, Fp_out), lambda i, k: (i, 0)),
            scratch_shapes=[pltpu.VMEM((bb, N1), jnp.float32)]),
        compiler_params=pltpu.CompilerParams(
            dimension_semantics=("parallel", "arbitrary"),
            vmem_limit_bytes=vmem_limit),
        cost_estimate=cost,
    )(*inputs)

    return out_p[:B, :f_out]


def residual_block(x, params, *, block_b=256, use_bf16=True, approx_gelu=False,
                   vmem_budget_bytes=None):
    """Convenience wrapper. In production, call prepare_params() once and
    reuse the prepared weights across calls (re-packing per call costs extra
    HBM traffic)."""
    prep = prepare_params(params, use_bf16=use_bf16)
    return residual_block_prepared(
        x, prep["w1p"], prep["w2p"], prep["prow"], f_out=prep["f_out"],
        block_b=block_b, use_bf16=use_bf16, approx_gelu=approx_gelu,
        vmem_budget_bytes=vmem_budget_bytes)


def init_params(key, in_features, out_features):
    ks = jax.random.split(key, 6)
    lim1 = 1.0 / jnp.sqrt(in_features)
    lim2 = 1.0 / jnp.sqrt(out_features)
    p = {
        # Linear weights stored pre-transposed: [in, out].
        "w1": jax.random.uniform(ks[0], (in_features, out_features), jnp.float32, -lim1, lim1),
        "b1": jax.random.uniform(ks[1], (1, out_features), jnp.float32, -lim1, lim1),
        "w2": jax.random.uniform(ks[2], (out_features, out_features), jnp.float32, -lim2, lim2),
        "b2": jax.random.uniform(ks[3], (1, out_features), jnp.float32, -lim2, lim2),
        "g1": jnp.ones((1, out_features), jnp.float32),
        "be1": jnp.zeros((1, out_features), jnp.float32),
        "g2": jnp.ones((1, out_features), jnp.float32),
        "be2": jnp.zeros((1, out_features), jnp.float32),
    }
    if in_features != out_features:
        p["wp"] = jax.random.uniform(ks[4], (in_features, out_features), jnp.float32, -lim1, lim1)
        p["bp"] = jax.random.uniform(ks[5], (1, out_features), jnp.float32, -lim1, lim1)
    # project is None when in == out -> identity residual handled in-kernel.
    return p


def _ref_forward(x, p, *, use_bf16=True):
    # Pure-JAX reference with matching matmul precision (eval-mode dropout).
    wdt = jnp.bfloat16 if use_bf16 else jnp.float32
    mm = lambda a, w: jnp.dot(a.astype(wdt), w.astype(wdt),
                              preferred_element_type=jnp.float32)

    def ln(h, g, b):
        mu = jnp.mean(h, -1, keepdims=True)
        var = jnp.mean((h - mu) ** 2, -1, keepdims=True)
        return (h - mu) * lax.rsqrt(var + _EPS) * g + b

    gelu = lambda h: 0.5 * h * (1.0 + lax.erf(h * _INV_SQRT2))
    identity = mm(x, p["wp"]) + p["bp"] if "wp" in p else x
    h = ln(mm(x, p["w1"]) + p["b1"], p["g1"], p["be1"])
    h = gelu(h)
    h = ln(mm(h, p["w2"]) + p["b2"], p["g2"], p["be2"])
    return gelu(h + identity)


if __name__ == "__main__":
    key = jax.random.PRNGKey(0)
    k_x, k_p, k_x2, k_p2, k_x3, k_p3, k_x4, k_p4 = jax.random.split(key, 8)

    # Case 1: in != out (real projection, fused [w1 | wp] matmul).
    B, F_IN, F_OUT = 16, 32, 64
    x = jax.random.normal(k_x, (B, F_IN), jnp.float32)
    params = init_params(k_p, F_IN, F_OUT)
    prep = prepare_params(params, use_bf16=True)     # hoisted weight prep
    out = residual_block_prepared(x, prep["w1p"], prep["w2p"], prep["prow"],
                                  f_out=prep["f_out"])
    out = jax.block_until_ready(out)
    ref = _ref_forward(x, params, use_bf16=True)
    assert out.shape == (B, F_OUT)
    err = float(jnp.max(jnp.abs(out - ref)))
    assert err < 2e-3, f"projection case mismatch: max abs err = {err}"

    # Case 2: in == out (project is None -> exact f32 residual pass-through).
    B2, F2 = 16, 64
    x2 = jax.random.normal(k_x2, (B2, F2), jnp.float32)
    params2 = init_params(k_p2, F2, F2)
    out2 = jax.block_until_ready(residual_block(x2, params2))
    ref2 = _ref_forward(x2, params2, use_bf16=True)
    assert out2.shape == (B2, F2)
    err2 = float(jnp.max(jnp.abs(out2 - ref2)))
    assert err2 < 2e-3, f"identity case mismatch: max abs err = {err2}"

    # Case 3: forced tiny VMEM plan budget -> exercises K-streaming of w1|wp.
    B3, F_IN3, F_OUT3 = 32, 512, 256
    x3 = jax.random.normal(k_x3, (B3, F_IN3), jnp.float32)
    params3 = init_params(k_p3, F_IN3, F_OUT3)
    out3 = jax.block_until_ready(
        residual_block(x3, params3, vmem_budget_bytes=600_000))
    ref3 = _ref_forward(x3, params3, use_bf16=True)
    assert out3.shape == (B3, F_OUT3)
    err3 = float(jnp.max(jnp.abs(out3 - ref3)))
    assert err3 < 2e-3, f"streaming case mismatch: max abs err = {err3}"

    # Case 4: K-streaming with project=None (identity via full-row x input).
    B4, F4 = 32, 256
    x4 = jax.random.normal(k_x4, (B4, F4), jnp.float32)
    params4 = init_params(k_p4, F4, F4)
    out4 = jax.block_until_ready(
        residual_block(x4, params4, vmem_budget_bytes=400_000))
    ref4 = _ref_forward(x4, params4, use_bf16=True)
    assert out4.shape == (B4, F4)
    err4 = float(jnp.max(jnp.abs(out4 - ref4)))
    assert err4 < 2e-3, f"streaming identity case mismatch: max abs err = {err4}"

    print("KERNEL_OK")
</pallas_src>

<mosaic_0001>
module attributes {stable_mosaic.version = 11 : i64} {
  func.func @_residual_block_kernel(%arg0: i32, %arg1: i32, %arg2: memref<8x128xbf16, #tpu.memory_space<vmem>>, %arg3: memref<128x256xbf16, #tpu.memory_space<vmem>>, %arg4: memref<128x128xbf16, #tpu.memory_space<vmem>>, %arg5: memref<8x128xf32, #tpu.memory_space<vmem>>, %arg6: memref<8x128xf32, #tpu.memory_space<vmem>>, %arg7: memref<8x256xf32, #tpu.memory_space<vmem>>) attributes {dimension_semantics = [#tpu.dimension_semantics<parallel>, #tpu.dimension_semantics<arbitrary>], iteration_bounds = array<i64: 2, 1>, scalar_prefetch = 0 : i64, scratch_operands = 1 : i64, tpu.core_type = #tpu.core_type<tc>, window_params = [{transform_indices = @transform_0, window_bounds = array<i64: 8, 128>}, {pipeline_mode = #tpu.pipeline_mode<synchronous>, transform_indices = @transform_1, window_bounds = array<i64: 128, 256>}, {pipeline_mode = #tpu.pipeline_mode<synchronous>, transform_indices = @transform_2, window_bounds = array<i64: 128, 128>}, {pipeline_mode = #tpu.pipeline_mode<synchronous>, transform_indices = @transform_3, window_bounds = array<i64: 8, 128>}, {transform_indices = @transform_4, window_bounds = array<i64: 8, 128>}]} {
    %c0_i32 = arith.constant 0 : i32
    %0 = arith.cmpi eq, %arg1, %c0_i32 : i32
    %1 = arith.extui %0 : i1 to i32
    %c0_i32_0 = arith.constant 0 : i32
    %2 = arith.cmpi ne, %1, %c0_i32_0 : i32
    scf.if %2 {
      %cst_10 = arith.constant 0.000000e+00 : f32
      %12 = vector.broadcast %cst_10 : f32 to vector<8x256xf32>
      %c0_11 = arith.constant 0 : index
      %c0_12 = arith.constant 0 : index
      %13 = vector.load %arg7[%c0_11, %c0_12] : memref<8x256xf32, #tpu.memory_space<vmem>>, vector<8x256xf32>
      tpu.vector_store %arg7[%c0_11, %c0_12], %12 {strides = array<i32>} : memref<8x256xf32, #tpu.memory_space<vmem>>, vector<8x256xf32>,
    } else {
    }
    %c0 = arith.constant 0 : index
    %c0_1 = arith.constant 0 : index
    %3 = vector.load %arg7[%c0, %c0_1] : memref<8x256xf32, #tpu.memory_space<vmem>>, vector<8x256xf32>
    %c0_2 = arith.constant 0 : index
    %c0_3 = arith.constant 0 : index
    %4 = vector.load %arg2[%c0_2, %c0_3] : memref<8x128xbf16, #tpu.memory_space<vmem>>, vector<8x128xbf16>
    %c0_4 = arith.constant 0 : index
    %c0_5 = arith.constant 0 : index
    %5 = vector.load %arg3[%c0_4, %c0_5] : memref<128x256xbf16, #tpu.memory_space<vmem>>, vector<128x256xbf16>
    %cst = arith.constant dense<0.000000e+00> : vector<8x256xf32>
    %6 = tpu.matmul %4, %5, %cst {dimension_numbers = #tpu.dot_dimension_numbers<[1], [0], [0], [1], [0, 0, 1, 1], [], []>} : vector<8x128xbf16>, vector<128x256xbf16>, vector<8x256xf32> -> vector<8x256xf32>
    %7 = arith.addf %3, %6 : vector<8x256xf32>
    %c0_6 = arith.constant 0 : index
    %c0_7 = arith.constant 0 : index
    %8 = vector.load %arg7[%c0_6, %c0_7] : memref<8x256xf32, #tpu.memory_space<vmem>>, vector<8x256xf32>
    tpu.vector_store %arg7[%c0_6, %c0_7], %7 {strides = array<i32>} : memref<8x256xf32, #tpu.memory_space<vmem>>, vector<8x256xf32>,
    %c0_i32_8 = arith.constant 0 : i32
    %9 = arith.cmpi eq, %arg1, %c0_i32_8 : i32
    %10 = arith.extui %9 : i1 to i32
    %c0_i32_9 = arith.constant 0 : i32
    %11 = arith.cmpi ne, %10, %c0_i32_9 : i32
    scf.if %11 {
      %c0_10 = arith.constant 0 : index
      %c0_11 = arith.constant 0 : index
      %12 = vector.load %arg5[%c0_10, %c0_11] : memref<8x128xf32, #tpu.memory_space<vmem>>, vector<1x128xf32>
      %c1 = arith.constant 1 : index
      %c0_12 = arith.constant 0 : index
      %13 = vector.load %arg5[%c1, %c0_12] : memref<8x128xf32, #tpu.memory_space<vmem>>, vector<1x128xf32>
      %c2 = arith.constant 2 : index
      %c0_13 = arith.constant 0 : index
      %14 = vector.load %arg5[%c2, %c0_13] : memref<8x128xf32, #tpu.memory_space<vmem>>, vector<1x128xf32>
      %c3 = arith.constant 3 : index
      %c0_14 = arith.constant 0 : index
      %15 = vector.load %arg5[%c3, %c0_14] : memref<8x128xf32, #tpu.memory_space<vmem>>, vector<1x128xf32>
      %c4 = arith.constant 4 : index
      %c0_15 = arith.constant 0 : index
      %16 = vector.load %arg5[%c4, %c0_15] : memref<8x128xf32, #tpu.memory_space<vmem>>, vector<1x128xf32>
      %c5 = arith.constant 5 : index
      %c0_16 = arith.constant 0 : index
      %17 = vector.load %arg5[%c5, %c0_16] : memref<8x128xf32, #tpu.memory_space<vmem>>, vector<1x128xf32>
      %c6 = arith.constant 6 : index
      %c0_17 = arith.constant 0 : index
      %18 = vector.load %arg5[%c6, %c0_17] : memref<8x128xf32, #tpu.memory_space<vmem>>, vector<1x128xf32>
      %c0_18 = arith.constant 0 : index
      %c0_19 = arith.constant 0 : index
      %19 = vector.load %arg7[%c0_18, %c0_19] : memref<8x256xf32, #tpu.memory_space<vmem>>, vector<8x256xf32>
      %20 = vector.extract_strided_slice %19 {offsets = [0, 0], sizes = [8, 128], strides = [1, 1]} : vector<8x256xf32> to vector<8x128xf32>
      %21 = vector.broadcast %12 : vector<1x128xf32> to vector<8x128xf32>
      %22 = arith.addf %20, %21 : vector<8x128xf32>
      %23 = vector.extract_strided_slice %19 {offsets = [0, 128], sizes = [8, 128], strides = [1, 1]} : vector<8x256xf32> to vector<8x128xf32>
      %24 = vector.broadcast %13 : vector<1x128xf32> to vector<8x128xf32>
      %25 = arith.addf %23, %24 : vector<8x128xf32>
      %cst_20 = arith.constant dense<0.000000e+00> : vector<8xf32>
      %26 = vector.multi_reduction <add>, %22, %cst_20 [1] : vector<8x128xf32> to vector<8xf32>
      %27 = vector.shape_cast %26 : vector<8xf32> to vector<8x1xf32>
      %cst_21 = arith.constant 1.562500e-02 : f32
      %28 = vector.broadcast %cst_21 : f32 to vector<8x1xf32>
      %29 = arith.mulf %27, %28 : vector<8x1xf32>
      %30 = arith.mulf %22, %22 : vector<8x128xf32>
      %cst_22 = arith.constant dense<0.000000e+00> : vector<8xf32>
      %31 = vector.multi_reduction <add>, %30, %cst_22 [1] : vector<8x128xf32> to vector<8xf32>
      %32 = vector.shape_cast %31 : vector<8xf32> to vector<8x1xf32>
      %cst_23 = arith.constant 1.562500e-02 : f32
      %33 = vector.broadcast %cst_23 : f32 to vector<8x1xf32>
      %34 = arith.mulf %32, %33 : vector<8x1xf32>
      %35 = arith.mulf %29, %29 : vector<8x1xf32>
      %36 = arith.subf %34, %35 : vector<8x1xf32>
      %37 = vector.broadcast %29 : vector<8x1xf32> to vector<8x128xf32>
      %38 = arith.subf %22, %37 : vector<8x128xf32>
      %cst_24 = arith.constant 9.99999974E-6 : f32
      %39 = vector.broadcast %cst_24 : f32 to vector<8x1xf32>
      %40 = arith.addf %36, %39 : vector<8x1xf32>
      %41 = math.rsqrt %40 : vector<8x1xf32>
      %42 = vector.broadcast %41 : vector<8x1xf32> to vector<8x128xf32>
      %43 = arith.mulf %38, %42 : vector<8x128xf32>
      %44 = vector.broadcast %15 : vector<1x128xf32> to vector<8x128xf32>
      %45 = arith.mulf %43, %44 : vector<8x128xf32>
      %46 = vector.broadcast %16 : vector<1x128xf32> to vector<8x128xf32>
      %47 = arith.addf %45, %46 : vector<8x128xf32>
      %cst_25 = arith.constant 5.000000e-01 : f32
      %48 = vector.broadcast %cst_25 : f32 to vector<8x128xf32>
      %49 = arith.mulf %48, %47 : vector<8x128xf32>
      %cst_26 = arith.constant 0.707106769 : f32
      %50 = vector.broadcast %cst_26 : f32 to vector<8x128xf32>
      %51 = arith.mulf %47, %50 : vector<8x128xf32>
      %52 = math.erf %51 : vector<8x128xf32>
      %cst_27 = arith.constant 1.000000e+00 : f32
      %53 = vector.broadcast %cst_27 : f32 to vector<8x128xf32>
      %54 = arith.addf %53, %52 : vector<8x128xf32>
      %55 = arith.mulf %49, %54 : vector<8x128xf32>
      %56 = arith.truncf %55 : vector<8x128xf32> to vector<8x128xbf16>
      %c0_28 = arith.constant 0 : index
      %c0_29 = arith.constant 0 : index
      %57 = vector.load %arg4[%c0_28, %c0_29] : memref<128x128xbf16, #tpu.memory_space<vmem>>, vector<128x128xbf16>
      %cst_30 = arith.constant dense<0.000000e+00> : vector<8x128xf32>
      %58 = tpu.matmul %56, %57, %cst_30 {dimension_numbers = #tpu.dot_dimension_numbers<[1], [0], [0], [1], [0, 0, 1, 1], [], []>} : vector<8x128xbf16>, vector<128x128xbf16>, vector<8x128xf32> -> vector<8x128xf32>
      %59 = vector.broadcast %14 : vector<1x128xf32> to vector<8x128xf32>
      %60 = arith.addf %58, %59 : vector<8x128xf32>
      %cst_31 = arith.constant dense<0.000000e+00> : vector<8xf32>
      %61 = vector.multi_reduction <add>, %60, %cst_31 [1] : vector<8x128xf32> to vector<8xf32>
      %62 = vector.shape_cast %61 : vector<8xf32> to vector<8x1xf32>
      %cst_32 = arith.constant 1.562500e-02 : f32
      %63 = vector.broadcast %cst_32 : f32 to vector<8x1xf32>
      %64 = arith.mulf %62, %63 : vector<8x1xf32>
      %65 = arith.mulf %60, %60 : vector<8x128xf32>
      %cst_33 = arith.constant dense<0.000000e+00> : vector<8xf32>
      %66 = vector.multi_reduction <add>, %65, %cst_33 [1] : vector<8x128xf32> to vector<8xf32>
      %67 = vector.shape_cast %66 : vector<8xf32> to vector<8x1xf32>
      %cst_34 = arith.constant 1.562500e-02 : f32
      %68 = vector.broadcast %cst_34 : f32 to vector<8x1xf32>
      %69 = arith.mulf %67, %68 : vector<8x1xf32>
      %70 = arith.mulf %64, %64 : vector<8x1xf32>
      %71 = arith.subf %69, %70 : vector<8x1xf32>
      %72 = vector.broadcast %64 : vector<8x1xf32> to vector<8x128xf32>
      %73 = arith.subf %60, %72 : vector<8x128xf32>
      %cst_35 = arith.constant 9.99999974E-6 : f32
      %74 = vector.broadcast %cst_35 : f32 to vector<8x1xf32>
      %75 = arith.addf %71, %74 : vector<8x1xf32>
      %76 = math.rsqrt %75 : vector<8x1xf32>
      %77 = vector.broadcast %76 : vector<8x1xf32> to vector<8x128xf32>
      %78 = arith.mulf %73, %77 : vector<8x128xf32>
      %79 = vector.broadcast %17 : vector<1x128xf32> to vector<8x128xf32>
      %80 = arith.mulf %78, %79 : vector<8x128xf32>
      %81 = vector.broadcast %18 : vector<1x128xf32> to vector<8x128xf32>
      %82 = arith.addf %80, %81 : vector<8x128xf32>
      %83 = arith.addf %82, %25 : vector<8x128xf32>
      %cst_36 = arith.constant 5.000000e-01 : f32
      %84 = vector.broadcast %cst_36 : f32 to vector<8x128xf32>
      %85 = arith.mulf %84, %83 : vector<8x128xf32>
      %cst_37 = arith.constant 0.707106769 : f32
      %86 = vector.broadcast %cst_37 : f32 to vector<8x128xf32>
      %87 = arith.mulf %83, %86 : vector<8x128xf32>
      %88 = math.erf %87 : vector<8x128xf32>
      %cst_38 = arith.constant 1.000000e+00 : f32
      %89 = vector.broadcast %cst_38 : f32 to vector<8x128xf32>
      %90 = arith.addf %89, %88 : vector<8x128xf32>
      %91 = arith.mulf %85, %90 : vector<8x128xf32>
      %c0_39 = arith.constant 0 : index
      %c0_40 = arith.constant 0 : index
      %92 = vector.load %arg6[%c0_39, %c0_40] : memref<8x128xf32, #tpu.memory_space<vmem>>, vector<8x128xf32>
      tpu.vector_store %arg6[%c0_39, %c0_40], %91 {strides = array<i32>} : memref<8x128xf32, #tpu.memory_space<vmem>>, vector<8x128xf32>,
    } else {
    }
    return
  }
  func.func @transform_0(%arg0: i32, %arg1: i32) -> (i32, i32) {
    %c0_i32 = arith.constant 0 : i32
    return %arg0, %arg1 : i32, i32
  }
  func.func @transform_1(%arg0: i32, %arg1: i32) -> (i32, i32) {
    %c0_i32 = arith.constant 0 : i32
    %c0_i32_0 = arith.constant 0 : i32
    %c0_i32_1 = arith.constant 0 : i32
    return %c0_i32, %c0_i32_0 : i32, i32
  }
  func.func @transform_2(%arg0: i32, %arg1: i32) -> (i32, i32) {
    %c0_i32 = arith.constant 0 : i32
    %c0_i32_0 = arith.constant 0 : i32
    %c0_i32_1 = arith.constant 0 : i32
    return %c0_i32, %c0_i32_0 : i32, i32
  }
  func.func @transform_3(%arg0: i32, %arg1: i32) -> (i32, i32) {
    %c0_i32 = arith.constant 0 : i32
    %c0_i32_0 = arith.constant 0 : i32
    %c0_i32_1 = arith.constant 0 : i32
    return %c0_i32, %c0_i32_0 : i32, i32
  }
  func.func @transform_4(%arg0: i32, %arg1: i32) -> (i32, i32) {
    %c0_i32 = arith.constant 0 : i32
    %c0_i32_0 = arith.constant 0 : i32
    return %arg0, %c0_i32 : i32, i32
  }
}

</mosaic_0001>

<bundles_post_ra>
// kernel: residual_block_prepared.1
= control target key start
LH: loop header
LB: loop body
LE: loop exit
PB: predicated region body
PF: predicated region fallthrough
CT: control target
= control target key end

     0   :  { %9 = vsyncpa [#allocation4], 0  ;;  %s1280_s0 = inlined_call_operand.vmem [shape: bf16[16,128], index: 0, kind: input, shape index: {}]   ;;  %s1281_s1 = inlined_call_operand.hbm [shape: bf16[128,256], index: 1, kind: input, shape index: {}]   ;;  %s1282_s2 = inlined_call_operand.hbm [shape: bf16[128,128], index: 2, kind: input, shape index: {}]   ;;  %s1283_s3 = inlined_call_operand.vmem [shape: f32[8,128], index: 3, kind: input, shape index: {}]   ;;  %s1284_s4 = inlined_call_operand.hbm [shape: f32[16,128], index: 4, kind: output, shape index: {}]  }
   0x1   :  { %10 = vsyncpa [#allocation7], 0 }
   0x2   :  { %11 = vsyncpa [#allocation5], 0 }
   0x3   :  { %13 = vsyncpa [#allocation5 + $0x1], 0  ;;  %s1069_s15 = smov 0   ;;  %s1071_s16 = smov 0  }
   0x4   :  { %s1073_s17 = smov 0   ;;  %s1075_s18 = smov 0  }
   0x5   :  { %s1077_s19 = smov 0   ;;  %s1079_s20 = smov 0  }
   0x6 LB: > { %s692_s21 = sadd.s32 4294967295, %s1032_s20   ;;  %s693_s22 = sadd.s32 4294967294, %s1032_s20   ;;  %s1032_s20 = sphi %s1079_s20, %s19_s20   ;;  %s1028_s19 = sphi %s1077_s19, %s1302_s19   ;;  %s1024_s18 = sphi %s1075_s18, %s1301_s18   ;;  %s1020_s17 = sphi %s1073_s17, %s1300_s17   ;;  %s1016_s16 = sphi %s1071_s16, %s1299_s16   ;;  %s1012_s15 = sphi %s1069_s15, %s1298_s15  }
   0x7   : > { %s31_s23 = sadd.s32 1, %s1028_s19  ;;  %s129_s24 = sadd.s32 1, %s1020_s17 }
   0x8   : > { %p33_p0 = scmp.ge.s32.totalorder %s31_s23, 2  ;;  %p139_p1 = scmp.ne.s32.totalorder %s1020_s17, %s1016_s16 }
   0x9   : > { %p140_p2 = scmp.eq.s32.totalorder %s692_s21, 1  ;;  %p145_p3 = scmp.ne.s32.totalorder %s1016_s16, %s1012_s15 }
   0xa   : > { %s1304_s23 = smov (%p33_p0, %s31_s23), 0  ;;  %p146_p5 = scmp.eq.s32.totalorder %s693_s22, 1 }
   0xb   : > { %p1109_p4 = por %p140_p2, %p139_p1  ;;  %s126_s26 = ssub.s32 %s1028_s19, %s1304_s23 }
   0xc   : > { %p694_p6 = scmp.ge.s32.totalorder %s1032_s20, 1  ;;  %p127_p7 = scmp.eq.s32.totalorder %s126_s26, 0 }
   0xd   : > { %s1289_s25 = scalar_select %p1109_p4, 1, 0 }
   0xe   : > { %p1116_p8 = por %p146_p5, %p145_p3  ;;  %p153_p9 = scmp.lt.s32.totalorder %s1032_s20, 3 }
   0xf   : > { %s1122_s28 = scalar_select %p127_p7, %s1020_s17, %s129_s24  }
  0x10   : > { %s1290_s27 = scalar_select %p1116_p8, 1, 0 }
  0x11   : > { %p1124_p10 = pnand %p694_p6, %p153_p9  ;;  %p1128_p11 = scmp.eq.s32.totalorder %s692_s21, 0 }
  0x12   : > { %s1034_s5 = smov [#allocation3]   ;;  %s1035_s8 = smov [#allocation6]  }
  0x13   : > { %s1291_s29 = scalar_select %p1124_p10, 1, 0 }
  0x14   : > { %s1292_s30 = scalar_select %p1128_p11, 1, 0 }
  0x15   : > { %p777_p12 = pneg %p1124_p10  ;;  %s165_s6 = sshll.u32 %s1034_s5, 4  ;;  %s166_s6 = int_to_ptr.vmem [resolvable:$true] %s165_s6 }
  0x16   : > { %s178_s9 = sshll.u32 %s1035_s8, 4  ;;  %s890_s12 = scalar_lea.hbm %s1281_s1, 2048  ;;  %s1140_s9 = int_to_ptr.vmem [resolvable:$true] %s178_s9 }
  0x17   : > { %p1136_p13 = pnand %p1128_p11, %p777_p12  ;;  %p891_p0 = scmp.ne.s32.totalorder %s1281_s1, %s890_s12 }
  0x18   : > { %p897_p5 = scmp.lt.u32.totalorder %s890_s12, %s1281_s1 }
  0x19   : > { %p892_p1 = pneg %p1136_p13 }
  0x1b   : > { %p893_p2 = pnand %p892_p1, %p891_p0 }
  0x1d   : > { %p894_p3 = pneg %p893_p2 }
  0x1f   : > { %p899_p6 = pnand %p897_p5, %p894_p3 }
  0x21   : > { %902 = shalt.err (!%p899_p6)
}
  0x22   : > { %s903_s24 = scalar_lea.vmem %s166_s6, 2048  ;;  %p911_p8 = scmp.lt.s32.totalorder %s166_s6, %s166_s6 }
  0x23   : > { %p904_p7 = scmp.ne.s32.totalorder %s166_s6, %s903_s24  ;;  %p912_p4 = scmp.lt.s32.totalorder %s903_s24, %s903_s24 }
  0x25   : > { %p906_p9 = pnand %p904_p7, %p892_p1  ;;  %p913_p11 = por %p912_p4, %p911_p8 }
  0x27   : > { %p907_p12 = pneg %p906_p9 }
  0x29   : > { %p914_p10 = pnand %p913_p11, %p907_p12 }
  0x2b   : > { %917 = shalt.err (!%p914_p10)
}
  0x2c   : > { %s1036_s26 = smov 128   ;;  %s1037_s5 = smov 8  }
  0x2d   : > { %780 = dma.hbm_to_vmem [thread:$0]  (!%p1136_p13), %s1281_s1, 2048, %s166_s6, [#allocation4], %s1036_s26, %s1036_s26, %s1037_s5  }
  0x2e   : > { %s918_s13 = scalar_lea.hbm %s1282_s2, 1024 }
  0x2f   : > { %p919_p0 = scmp.ne.s32.totalorder %s1282_s2, %s918_s13  ;;  %p925_p10 = scmp.lt.u32.totalorder %s918_s13, %s1282_s2 }
  0x31   : > { %p921_p4 = pnand %p919_p0, %p892_p1 }
  0x33   : > { %p922_p8 = pneg %p921_p4 }
  0x35   : > { %p927_p11 = pnand %p925_p10, %p922_p8 }
  0x37   : > { %930 = shalt.err (!%p927_p11)
}
  0x38   : > { %s931_s6 = scalar_lea.vmem %s1140_s9, 1024  ;;  %p939_p6 = scmp.lt.s32.totalorder %s1140_s9, %s1140_s9 }
  0x39   : > { %p932_p2 = scmp.ne.s32.totalorder %s1140_s9, %s931_s6  ;;  %p940_p7 = scmp.lt.s32.totalorder %s931_s6, %s931_s6 }
  0x3b   : > { %p934_p3 = pnand %p932_p2, %p892_p1  ;;  %p941_p9 = por %p940_p7, %p939_p6 }
  0x3d   : > { %p935_p5 = pneg %p934_p3 }
  0x3f   : > { %p942_p12 = pnand %p941_p9, %p935_p5 }
  0x41   : > { %945 = shalt.err (!%p942_p12)
}
  0x42   : > { %s1038_s26 = smov 64   ;;  %s1039_s5 = smov 4  }
  0x43   : > { %783 = dma.hbm_to_vmem [thread:$0]  (!%p1136_p13), %s1282_s2, 1024, %s1140_s9, [#allocation7], %s1038_s26, %s1038_s26, %s1039_s5  }
  0x44   : > { %p1294_p0 = scmp.ne.s32.totalorder %s1291_s29, 0 }
  0x45   : > { %p1295_p1 = scmp.ne.s32.totalorder (!%p1294_p0), %s1292_s30, 0 }
  0x46   : > { %207 = sbr.rel (%p1294_p0) target bundleno = 931 (0x3a3), region = 36 }
  0x4d   : > { %999 = dma.done.wait (%p1295_p1), [#allocation4], 2048  }
  0x4e   : > { %1001 = vsyncadd (%p1295_p1), [#allocation4], 4294965248 }
  0x4f   : > { %1003 = dma.done.wait (%p1295_p1), [#allocation7], 1024  }
  0x50   : > { %1005 = vsyncadd (%p1295_p1), [#allocation7], 4294966272  ;;  %v1040_v0 = vmov 0   ;;  %v850_v1 = vld [vmem:[#allocation3 + $0x4] ss:$8 sps:$4 sm:$0xff]   ;;  %p239_p13 = scmp.lt.s32.totalorder %s1024_s18, 1 }
  0x51   : > { %384 = vmatprep.mubr.bf16.mxu0 %v1040_v0  ;;  %v852_v2 = vld [vmem:[#allocation3] ss:$8 sps:$4 sm:$0xff]   ;;  %352 = vmatprep.subr.bf16.mxu0 %v850_v1  ;;  %v853_v3 = vld [vmem:[#allocation3 + $0x14] ss:$8 sps:$4 sm:$0xff]   ;;  %v855_v4 = vld [vmem:[#allocation3 + $0x10] ss:$8 sps:$4 sm:$0xff]  }
  0x52   : > { %353 = vmatpush1.bf16.msra.mxu0 %v852_v2  ;;  %v856_v5 = vld [vmem:[#allocation3 + $0x24] ss:$8 sps:$4 sm:$0xff]   ;;  %v858_v6 = vld [vmem:[#allocation3 + $0x20] ss:$8 sps:$4 sm:$0xff]   ;;  %v859_v7 = vld [vmem:[#allocation3 + $0x34] ss:$8 sps:$4 sm:$0xff]  }
  0x53   : > { %354 = vmatprep.subr.bf16.mxu0 %v853_v3  ;;  %v861_v8 = vld [vmem:[#allocation3 + $0x30] ss:$8 sps:$4 sm:$0xff]   ;;  %v862_v9 = vld [vmem:[#allocation3 + $0x44] ss:$8 sps:$4 sm:$0xff]   ;;  %v864_v10 = vld [vmem:[#allocation3 + $0x40] ss:$8 sps:$4 sm:$0xff]  }
  0x54   : > { %v865_v11 = vld [vmem:[#allocation3 + $0x54] ss:$8 sps:$4 sm:$0xff]   ;;  %v867_v12 = vld [vmem:[#allocation3 + $0x50] ss:$8 sps:$4 sm:$0xff]   ;;  %v868_v13 = vld [vmem:[#allocation3 + $0x64] ss:$8 sps:$4 sm:$0xff]  }
  0x55   : > { %s240_s29 = scalar_select %p239_p13, %s1024_s18, 1  ;;  %v870_v14 = vld [vmem:[#allocation3 + $0x60] ss:$8 sps:$4 sm:$0xff]   ;;  %v871_v15 = vld [vmem:[#allocation3 + $0x74] ss:$8 sps:$4 sm:$0xff]   ;;  %v1041_v26 = vmov 0.0  }
  0x56   : > { %355 = vmatpush1.bf16.msra.mxu0 %v855_v4  ;;  %v873_v16 = vld [vmem:[#allocation3 + $0x70] ss:$8 sps:$4 sm:$0xff]   ;;  %v874_v25 = vld [vmem:[#allocation6] sm:$0xff]   ;;  %747 = vmatprep.subr.bf16.mxu1 %v1041_v26  ;;  %vm1042_vm0 = vmmov 0   ;;  %v875_v27 = vld [vmem:[#allocation6 + $0x8] sm:$0xff]   ;;  %s236_s9 = sand.u32 1, %s1016_s16  }
  0x57   : > { %356 = vmatprep.subr.bf16.mxu0 %v856_v5  ;;  %s702_s30 = sshll.u32 %s240_s29, 2  ;;  %v719_v18 = vld [vmem:[%s1283_s3] ss:$0 sm:$0xff]  ;;  %763 = vmatprep.mubr.msk.bf16.mxu1 %vm1042_vm0, %v1041_v26  ;;  %v877_v29 = vld [vmem:[#allocation6 + $0x18] sm:$0xff]   ;;  %v878_v30 = vld [vmem:[#allocation6 + $0x20] sm:$0xff]   ;;  %s735_s12 = sshll.u32 %s1024_s18, 7 }
  0x58   : > { %s245_s11 = scalar_lea.vmem %s1280_s0, %s702_s30  ;;  %748 = vmatpush3.bf16.msra.mxu1 %v874_v25  ;;  %v876_v28 = vld [vmem:[#allocation6 + $0x10] sm:$0xff]   ;;  %v879_v31 = vld [vmem:[#allocation6 + $0x28] sm:$0xff]   ;;  %v881_v33 = vld [vmem:[#allocation6 + $0x38] sm:$0xff]   ;;  %s1233_s24 = scalar_lea.hbm %s1284_s4, %s735_s12 }
  0x59   : > { %v255_v17 = vld [vmem:[%s245_s11] sm:$0xf]  ;;  %749 = vmatprep.subr.bf16.mxu1 %v1041_v26  ;;  %v722_v45 = vld [vmem:[%s1283_s3 + $0x4] ss:$0 sm:$0xff]  ;;  %s701_s11 = sshll.u32 %s236_s9, 3  ;;  %s587_s6 = scalar_lea.sflag [#allocation5], %s236_s9 }
  0x5a   : > { %357 = vmatpush1.bf16.msra.mxu0 %v858_v6  ;;  %v880_v32 = vld [vmem:[#allocation6 + $0x30] sm:$0xff]   ;;  %s238_s13 = scalar_lea.vmem [#allocation8], %s701_s11  ;;  %p1296_p8 = scmp.ne.s32.totalorder %s1289_s25, 0 }
  0x5b   : > { %358 = vmatprep.subr.bf16.mxu0 %v859_v7  ;;  %v721_v43 = vld [vmem:[%s1283_s3 + $0x3] ss:$0 sm:$0xff]  ;;  %v723_v54 = vld [vmem:[%s1283_s3 + $0x2] ss:$0 sm:$0xff]  ;;  %v732_v6 = vld [vmem:[%s1283_s3 + $0x5] ss:$0 sm:$0xff] }
  0x5c   : > { %750 = vmatpush3.bf16.msra.mxu1 %v875_v27  ;;  %s600_s14 = sshll.u32 %s238_s13, 4  ;;  %s1043_s18 = smov [#allocation8]   ;;  %s1235_s14 = int_to_ptr.vmem [resolvable:$true] %s600_s14 }
  0x5d   : > { %751 = vmatprep.subr.bf16.mxu1 %v1041_v26  ;;  %s946_s26 = scalar_lea.vmem %s1235_s14, 128  ;;  %s950_s5 = sshll.u32 %s1043_s18, 4  ;;  %s951_s5 = int_to_ptr.vmem [resolvable:$false] %s950_s5 }
  0x5e   : > { %359 = vmatpush1.bf16.msra.mxu0 %v861_v8  ;;  %v720_v8 = vld [vmem:[%s1283_s3 + $0x1] ss:$0 sm:$0xff]  ;;  %p947_p4 = scmp.ne.s32.totalorder %s1235_s14, %s946_s26  ;;  %s952_s8 = scalar_lea.vmem %s951_s5, 256 }
  0x5f   : > { %360 = vmatprep.subr.bf16.mxu0 %v862_v9  ;;  %v733_v9 = vld [vmem:[%s1283_s3 + $0x6] ss:$0 sm:$0xff]  ;;  %p953_p2 = scmp.lt.s32.totalorder %s1235_s14, %s951_s5  ;;  %p954_p3 = scmp.lt.s32.totalorder %s952_s8, %s946_s26 }
  0x60   : > { %752 = vmatpush3.bf16.msra.mxu1 %v876_v28  ;;  %p948_p10 = pnand %p947_p4, %p1296_p8 }
  0x61   : > { %753 = vmatprep.subr.bf16.mxu1 %v1041_v26  ;;  %p955_p5 = por %p954_p3, %p953_p2 }
  0x62   : > { %361 = vmatpush1.bf16.msra.mxu0 %v864_v10  ;;  %p949_p11 = pneg %p948_p10 }
  0x63   : > { %362 = vmatprep.subr.bf16.mxu0 %v865_v11 }
  0x64   : > { %754 = vmatpush3.bf16.msra.mxu1 %v877_v29  ;;  %p956_p6 = pnand %p955_p5, %p949_p11 }
  0x65   : > { %755 = vmatprep.subr.bf16.mxu1 %v1041_v26 }
  0x66   : > { %363 = vmatpush1.bf16.msra.mxu0 %v867_v12 }
  0x67   : > { %364 = vmatprep.subr.bf16.mxu0 %v868_v13 }
  0x68   : > { %756 = vmatpush3.bf16.msra.mxu1 %v878_v30 }
  0x69   : > { %757 = vmatprep.subr.bf16.mxu1 %v1041_v26 }
  0x6a   : > { %365 = vmatpush1.bf16.msra.mxu0 %v870_v14 }
  0x6b   : > { %366 = vmatprep.subr.bf16.mxu0 %v871_v15 }
  0x6c   : > { %758 = vmatpush3.bf16.msra.mxu1 %v879_v31 }
  0x6d   : > { %759 = vmatprep.subr.bf16.mxu1 %v1041_v26 }
  0x6e   : > { %367 = vmatpush1.bf16.msra.mxu0 %v873_v16 }
  0x70   : > { %760 = vmatpush3.bf16.msra.mxu1 %v880_v32 }
  0x71   : > { %385 = vmatmul.mubr.bf16.vlgmr.msra.gmra.mrb[0].mxu0 %v255_v17  ;;  %761 = vmatprep.subr.bf16.mxu1 %v1041_v26 }
  0x74   : > { %762 = vmatpush3.bf16.msra.mxu1 %v881_v33 }
 0x144   : > { %v386_v19 = vpop.f32.mrb[0].mxu0 }
 0x145   : > { %v413_v20 = vadd.f32 %v719_v18, %v386_v19  ;;  %v1207_v21 = vpop.f32.mrb[1].mxu0 }
 0x146   : > { %v390_v22 = vpop.f32.mrb[2].mxu0  ;;  %v418_v11 = vadd.f32 %v720_v8, %v1207_v21 }
 0x147   : > { %419 = vadd.xlane.f32.xlu0 %v413_v20  ;;  %v391_v23 = vpop.f32.mrb[3].mxu0  ;;  %v422_v24 = vmul.f32 %v413_v20, %v413_v20 }
 0x14b   : > { %423 = vadd.xlane.f32.xlu0 %v422_v24 }
 0x1d4   : > { %v420_v34 = vpop.xlane.xlu0 %419 }
 0x1d5   : > { %v421_v35 = vmul.f32 0.015625, %v420_v34 }
 0x1d7   : > { %v426_v37 = vmul.f32 %v421_v35, %v421_v35  ;;  %v428_v41 = vsub.f32 %v413_v20, %v421_v35 }
 0x1d8   : > { %v424_v36 = vpop.xlane.xlu0 %423 }
 0x1d9   : > { %v425_v38 = vmul.f32 0.015625, %v424_v36 }
 0x1db   : > { %v427_v39 = vsub.f32 %v425_v38, %v426_v37 }
 0x1dd   : > { %v429_v40 = vadd.f32 1e-05, %v427_v39 }
 0x1df   : > { %882 = vrsqrt.f32 %v429_v40 }
 0x1e9   : > { %v883_v42 = vpop.eup %882 }
 0x1ea   : > { %v431_v44 = vmul.f32 %v883_v42, %v428_v41 }
 0x1ec   : > { %v436_v46 = vmul.f32 %v721_v43, %v431_v44 }
 0x1ee   : > { %v441_v47 = vadd.f32 %v722_v45, %v436_v46 }
 0x1f0   : > { %v443_v48 = vmul.f32 0.70710677, %v441_v47  ;;  %v442_v50 = vmul.f32 0.5, %v441_v47 }
 0x1f2   : > { %884 = verf.f32 %v443_v48 }
 0x1fc   : > { %v885_v49 = vpop.eup %884 }
 0x1fd   : > { %v445_v51 = vadd.f32 1.0, %v885_v49 }
 0x1ff   : > { %v446_v52 = vmul.f32 %v445_v51, %v442_v50 }
 0x201   : > { %v447_v53 = vpack.c.bf16 %v446_v52, %v446_v52 }
 0x203   : > { %764 = vmatmul.mubr.bf16.vlgmr.msra.gmra.mrb[0].mxu1 %v447_v53 }
 0x2d6   : > { %v550_v55 = vpop.f32.mrb[0].mxu1 }
 0x2d7   : > { %v551_v56 = vadd.f32 %v723_v54, %v550_v55  ;;  %v765_v57 = vpop.f32.mrb[1].mxu1 }
 0x2d8   : > { %v553_v58 = vpop.f32.mrb[2].mxu1 }
 0x2d9   : > { %556 = vadd.xlane.f32.xlu1 %v551_v56  ;;  %v766_v59 = vpop.f32.mrb[3].mxu1  ;;  %v559_v60 = vmul.f32 %v551_v56, %v551_v56 }
 0x2dd   : > { %560 = vadd.xlane.f32.xlu1 %v559_v60 }
 0x366   : > { %v557_v61 = vpop.xlane.xlu1 %556 }
 0x367   : > { %v558_v62 = vmul.f32 0.015625, %v557_v61 }
 0x369   : > { %v563_v0 = vmul.f32 %v558_v62, %v558_v62  ;;  %v565_v4 = vsub.f32 %v551_v56, %v558_v62 }
 0x36a   : > { %v561_v63 = vpop.xlane.xlu1 %560 }
 0x36b   : > { %v562_v1 = vmul.f32 0.015625, %v561_v63 }
 0x36d   : > { %v564_v2 = vsub.f32 %v562_v1, %v563_v0 }
 0x36f   : > { %v566_v3 = vadd.f32 1e-05, %v564_v2 }
 0x371   : > { %886 = vrsqrt.f32 %v566_v3 }
 0x37b   : > { %v887_v5 = vpop.eup %886 }
 0x37c   : > { %v568_v7 = vmul.f32 %v887_v5, %v565_v4 }
 0x37e   : > { %v573_v10 = vmul.f32 %v732_v6, %v568_v7 }
 0x380   : > { %v578_v12 = vadd.f32 %v733_v9, %v573_v10 }
 0x382   : > { %v579_v13 = vadd.f32 %v578_v12, %v418_v11 }
 0x384   : > { %v581_v14 = vmul.f32 0.70710677, %v579_v13  ;;  %v580_v16 = vmul.f32 0.5, %v579_v13 }
 0x386   : > { %888 = verf.f32 %v581_v14 }
 0x390   : > { %v889_v15 = vpop.eup %888 }
 0x391   : > { %v583_v17 = vadd.f32 1.0, %v889_v15 }
 0x393   : > { %v584_v18 = vmul.f32 %v583_v17, %v580_v16 }
 0x395   : > { %585 = vst [vmem:[%s238_s13] sm:$0xff] %v584_v18 }
 0x396   : > { %959 = shalt.err (!%p956_p6)
}
 0x397   : > { %s960_s10 = scalar_lea.hbm %s1233_s24, 128  ;;  %s964_s7 = scalar_lea.hbm %s1284_s4, 256 }
 0x398   : > { %p961_p7 = scmp.ne.s32.totalorder %s1233_s24, %s960_s10  ;;  %p965_p0 = scmp.lt.u32.totalorder %s1233_s24, %s1284_s4 }
 0x399   : > { %p966_p1 = scmp.lt.u32.totalorder %s964_s7, %s960_s10  ;;  %p968_p4 = scmp.lt.u32.totalorder %s960_s10, %s1233_s24 }
 0x39a   : > { %p962_p9 = pnand %p961_p7, %p1296_p8 }
 0x39b   : > { %p967_p13 = por %p966_p1, %p965_p0 }
 0x39c   : > { %p963_p12 = pneg %p962_p9 }
 0x39d   : > { %p969_p10 = por %p968_p4, %p967_p13 }
 0x39f   : > { %p970_p11 = pnand %p969_p10, %p963_p12 }
 0x3a1   : > { %973 = shalt.err (!%p970_p11)
}
 0x3a2   : > { %775 = dma.vmem_to_hbm [thread:$0]  (%p1296_p8), %s1235_s14, 128, %s1233_s24, %s587_s6  }
 0x3a3 PF: > { %p792_p2 = scmp.ge.s32.totalorder %s1032_s20, 2  ;;  %s612_s12 = sand.u32 1, %s1012_s15  }
 0x3a4   : > { %p1297_p3 = scmp.ne.s32.totalorder %s1290_s27, 0  ;;  %s613_s13 = scalar_lea.sflag [#allocation5], %s612_s12 }
 0x3a6   : > { %p785_p5 = pnand %p792_p2, %p1297_p3 }
 0x3a8   : > { %1007 = dma.done.wait (!%p785_p5), %s613_s13, 128  }
 0x3a9   : > { %1009 = vsyncadd (!%p785_p5), %s613_s13, 4294967168  ;;  %s19_s20 = sadd.s32 1, %s1032_s20   ;;  %s1298_s15 = smov %s1016_s16 }
 0x3aa   : > { %p16_p6 = scmp.ge.s32.totalorder %s19_s20, 4   ;;  %s1299_s16 = smov %s1020_s17 }
 0x3ab   : > { %s1300_s17 = smov %s1122_s28  ;;  %s1301_s18 = smov %s1028_s19 }
 0x3ac   : > { %s1302_s19 = smov %s1304_s23  ;;  %18 = sbr.rel (!%p16_p6) target bundleno = 6 (0x6), region = 88 }
 0x3b3   :  { %618 = vsyncpa [#allocation4], 1 }
 0x3b4   :  { %620 = vsyncpa [#allocation4 + $0x1], 1 }
 0x3b5   :  { %621 = vsyncpa [#allocation7], 1 }
 0x3b6   :  { %622 = vsyncpa [#allocation5], 1 }
 0x3b7   :  { %624 = vsyncpa [#allocation5 + $0x1], 1 }

</bundles_post_ra>
